<compile_context>
chip_gen: v6e
topology: v6e:2x2x1
jax: 0.10.0
libtpu: 0.0.40
codegen_flags: <defaults>
</compile_context>

<pallas_src>
import functools

import jax
import jax.numpy as jnp
from jax import lax
from jax.experimental import pallas as pl
from jax.experimental.pallas import tpu as pltpu

_EPS = 1e-12  # F.normalize(p=2, dim=1) default eps


def _l2_normalize(x):
    # x / max(||x||, eps)  ==  x * rsqrt(max(||x||^2, eps^2))
    ss = jnp.sum(x * x, axis=1, keepdims=True)
    return x * lax.rsqrt(jnp.maximum(ss, _EPS * _EPS))


def _ntxent_kernel(r1_ref, r2_ref, c1_ref, c2_ref, loss_ref, *, tile_b: int,
                   inv_temperature: float):
    """One row-block of the NT-Xent cross-view loss.

    r1_ref, r2_ref : VMEM [tile_b, D]  current row tile of view1 / view2
    c1_ref, c2_ref : VMEM [B, D]       full view1 / view2 (column side, resident)
    loss_ref       : VMEM [2*tile_b,1] per-row losses (view1 rows, then view2 rows)
    """
    inv_t = inv_temperature

    r1 = _l2_normalize(r1_ref[...].astype(jnp.float32))
    r2 = _l2_normalize(r2_ref[...].astype(jnp.float32))
    c1 = _l2_normalize(c1_ref[...].astype(jnp.float32))
    c2 = _l2_normalize(c2_ref[...].astype(jnp.float32))

    # positives[k] = sim[k, k +/- B] = <v1n[k], v2n[k]>   (row-wise dot, O(B*D))
    pos = jnp.sum(r1 * r2, axis=1, keepdims=True)          # [tile_b, 1]
    # exact self-similarity (diagonal of sim); subtracted instead of eye-masking
    diag1 = jnp.sum(r1 * r1, axis=1, keepdims=True)        # [tile_b, 1]
    diag2 = jnp.sum(r2 * r2, axis=1, keepdims=True)        # [tile_b, 1]

    # A @ B^T on the MXU without materializing B^T or concat(feats).
    dn = (((1,), (1,)), ((), ()))
    s11 = lax.dot_general(r1, c1, dn, preferred_element_type=jnp.float32)  # [tile_b, B]
    s12 = lax.dot_general(r1, c2, dn, preferred_element_type=jnp.float32)
    s21 = lax.dot_general(r2, c1, dn, preferred_element_type=jnp.float32)
    s22 = lax.dot_general(r2, c2, dn, preferred_element_type=jnp.float32)

    esum1 = (jnp.sum(jnp.exp(s11 * inv_t), axis=1, keepdims=True)
             + jnp.sum(jnp.exp(s12 * inv_t), axis=1, keepdims=True))       # [tile_b, 1]
    esum2 = (jnp.sum(jnp.exp(s21 * inv_t), axis=1, keepdims=True)
             + jnp.sum(jnp.exp(s22 * inv_t), axis=1, keepdims=True))

    denom1 = esum1 - jnp.exp(diag1 * inv_t)
    denom2 = esum2 - jnp.exp(diag2 * inv_t)

    # -log(exp(pos/T) / denom) == log(denom) - pos/T
    loss_ref[0:tile_b, :] = jnp.log(denom1) - pos * inv_t
    loss_ref[tile_b:2 * tile_b, :] = jnp.log(denom2) - pos * inv_t


def xnet_loss_cross_view(view1, view2, temperature: float = 0.5):
    """Pallas-backed equivalent of XNetLossCrossView.forward(view1, view2)."""
    assert view1.shape == view2.shape and view1.ndim == 2
    b, d = view1.shape

    # Row tile: 128 rows per view per step when possible, else whole batch.
    tile_b = 128 if (b % 128 == 0) else b
    nb = b // tile_b

    kernel = functools.partial(
        _ntxent_kernel, tile_b=tile_b, inv_temperature=1.0 / float(temperature)
    )

    per_row = pl.pallas_call(
        kernel,
        out_shape=jax.ShapeDtypeStruct((2 * b, 1), jnp.float32),
        grid=(nb,),
        in_specs=[
            # row tiles (pipelined per grid step)
            pl.BlockSpec((tile_b, d), lambda i: (i, 0), memory_space=pltpu.VMEM),
            pl.BlockSpec((tile_b, d), lambda i: (i, 0), memory_space=pltpu.VMEM),
            # full views (column side, resident across steps)
            pl.BlockSpec((b, d), lambda i: (0, 0), memory_space=pltpu.VMEM),
            pl.BlockSpec((b, d), lambda i: (0, 0), memory_space=pltpu.VMEM),
        ],
        out_specs=pl.BlockSpec((2 * tile_b, 1), lambda i: (i, 0),
                               memory_space=pltpu.VMEM),
        compiler_params=pltpu.CompilerParams(
            dimension_semantics=("parallel",)),
    )(view1, view2, view1, view2)

    # Tiny final mean done in XLA so the row-block grid axis stays "parallel"
    # (no cross-block accumulation race across TensorCores).
    return jnp.sum(per_row) / (2.0 * b)


def _reference_loss(view1, view2, temperature):
    """Pure-JAX reference mirroring the PyTorch forward exactly."""
    b = view1.shape[0]
    eps = 1e-12
    v1 = view1 / jnp.maximum(jnp.linalg.norm(view1, axis=1, keepdims=True), eps)
    v2 = view2 / jnp.maximum(jnp.linalg.norm(view2, axis=1, keepdims=True), eps)
    feats = jnp.concatenate([v1, v2], axis=0)
    sim = feats @ feats.T
    sim_ij = jnp.diagonal(sim, offset=b)
    sim_ji = jnp.diagonal(sim, offset=-b)
    positives = jnp.concatenate([sim_ij, sim_ji], axis=0)
    nominator = jnp.exp(positives / temperature)
    mask = 1.0 - jnp.eye(2 * b, dtype=jnp.float32)
    denominator = mask * jnp.exp(sim / temperature)
    losses = -jnp.log(nominator / jnp.sum(denominator, axis=1))
    return jnp.sum(losses) / (2 * b)


if __name__ == "__main__":
    key = jax.random.PRNGKey(0)
    k1, k2 = jax.random.split(key)

    B, D = 8, 32          # small shapes: batch=8, hidden=32
    TEMPERATURE = 0.5

    view1 = jax.random.normal(k1, (B, D), dtype=jnp.float32)
    view2 = jax.random.normal(k2, (B, D), dtype=jnp.float32)

    loss = jax.block_until_ready(xnet_loss_cross_view(view1, view2, TEMPERATURE))
    ref = jax.block_until_ready(_reference_loss(view1, view2, TEMPERATURE))
    assert jnp.allclose(loss, ref, rtol=1e-5, atol=1e-5), (loss, ref)

    print("KERNEL_OK")
</pallas_src>

<mosaic_0001>
module attributes {stable_mosaic.version = 11 : i64} {
  func.func @_ntxent_kernel(%arg0: i32, %arg1: memref<8x32xf32, #tpu.memory_space<vmem>>, %arg2: memref<8x32xf32, #tpu.memory_space<vmem>>, %arg3: memref<8x32xf32, #tpu.memory_space<vmem>>, %arg4: memref<8x32xf32, #tpu.memory_space<vmem>>, %arg5: memref<16x1xf32, #tpu.memory_space<vmem>>) attributes {dimension_semantics = [#tpu.dimension_semantics<parallel>], iteration_bounds = array<i64: 1>, scalar_prefetch = 0 : i64, scratch_operands = 0 : i64, tpu.core_type = #tpu.core_type<tc>, window_params = [{transform_indices = @transform_0, window_bounds = array<i64: 8, 32>}, {transform_indices = @transform_1, window_bounds = array<i64: 8, 32>}, {pipeline_mode = #tpu.pipeline_mode<synchronous>, transform_indices = @transform_2, window_bounds = array<i64: 8, 32>}, {pipeline_mode = #tpu.pipeline_mode<synchronous>, transform_indices = @transform_3, window_bounds = array<i64: 8, 32>}, {transform_indices = @transform_4, window_bounds = array<i64: 16, 1>}]} {
    %c0 = arith.constant 0 : index
    %c0_0 = arith.constant 0 : index
    %0 = vector.load %arg1[%c0, %c0_0] : memref<8x32xf32, #tpu.memory_space<vmem>>, vector<8x32xf32>
    %1 = arith.mulf %0, %0 : vector<8x32xf32>
    %cst = arith.constant dense<0.000000e+00> : vector<8xf32>
    %2 = vector.multi_reduction <add>, %1, %cst [1] : vector<8x32xf32> to vector<8xf32>
    %3 = vector.shape_cast %2 : vector<8xf32> to vector<8x1xf32>
    %cst_1 = arith.constant 1.000000e-24 : f32
    %4 = vector.broadcast %cst_1 : f32 to vector<8x1xf32>
    %5 = arith.maximumf %3, %4 : vector<8x1xf32>
    %6 = math.rsqrt %5 : vector<8x1xf32>
    %7 = vector.broadcast %6 : vector<8x1xf32> to vector<8x32xf32>
    %8 = arith.mulf %0, %7 : vector<8x32xf32>
    %c0_2 = arith.constant 0 : index
    %c0_3 = arith.constant 0 : index
    %9 = vector.load %arg2[%c0_2, %c0_3] : memref<8x32xf32, #tpu.memory_space<vmem>>, vector<8x32xf32>
    %10 = arith.mulf %9, %9 : vector<8x32xf32>
    %cst_4 = arith.constant dense<0.000000e+00> : vector<8xf32>
    %11 = vector.multi_reduction <add>, %10, %cst_4 [1] : vector<8x32xf32> to vector<8xf32>
    %12 = vector.shape_cast %11 : vector<8xf32> to vector<8x1xf32>
    %cst_5 = arith.constant 1.000000e-24 : f32
    %13 = vector.broadcast %cst_5 : f32 to vector<8x1xf32>
    %14 = arith.maximumf %12, %13 : vector<8x1xf32>
    %15 = math.rsqrt %14 : vector<8x1xf32>
    %16 = vector.broadcast %15 : vector<8x1xf32> to vector<8x32xf32>
    %17 = arith.mulf %9, %16 : vector<8x32xf32>
    %c0_6 = arith.constant 0 : index
    %c0_7 = arith.constant 0 : index
    %18 = vector.load %arg3[%c0_6, %c0_7] : memref<8x32xf32, #tpu.memory_space<vmem>>, vector<8x32xf32>
    %19 = arith.mulf %18, %18 : vector<8x32xf32>
    %cst_8 = arith.constant dense<0.000000e+00> : vector<8xf32>
    %20 = vector.multi_reduction <add>, %19, %cst_8 [1] : vector<8x32xf32> to vector<8xf32>
    %21 = vector.shape_cast %20 : vector<8xf32> to vector<8x1xf32>
    %cst_9 = arith.constant 1.000000e-24 : f32
    %22 = vector.broadcast %cst_9 : f32 to vector<8x1xf32>
    %23 = arith.maximumf %21, %22 : vector<8x1xf32>
    %24 = math.rsqrt %23 : vector<8x1xf32>
    %25 = vector.broadcast %24 : vector<8x1xf32> to vector<8x32xf32>
    %26 = arith.mulf %18, %25 : vector<8x32xf32>
    %c0_10 = arith.constant 0 : index
    %c0_11 = arith.constant 0 : index
    %27 = vector.load %arg4[%c0_10, %c0_11] : memref<8x32xf32, #tpu.memory_space<vmem>>, vector<8x32xf32>
    %28 = arith.mulf %27, %27 : vector<8x32xf32>
    %cst_12 = arith.constant dense<0.000000e+00> : vector<8xf32>
    %29 = vector.multi_reduction <add>, %28, %cst_12 [1] : vector<8x32xf32> to vector<8xf32>
    %30 = vector.shape_cast %29 : vector<8xf32> to vector<8x1xf32>
    %cst_13 = arith.constant 1.000000e-24 : f32
    %31 = vector.broadcast %cst_13 : f32 to vector<8x1xf32>
    %32 = arith.maximumf %30, %31 : vector<8x1xf32>
    %33 = math.rsqrt %32 : vector<8x1xf32>
    %34 = vector.broadcast %33 : vector<8x1xf32> to vector<8x32xf32>
    %35 = arith.mulf %27, %34 : vector<8x32xf32>
    %36 = arith.mulf %8, %17 : vector<8x32xf32>
    %cst_14 = arith.constant dense<0.000000e+00> : vector<8xf32>
    %37 = vector.multi_reduction <add>, %36, %cst_14 [1] : vector<8x32xf32> to vector<8xf32>
    %38 = vector.shape_cast %37 : vector<8xf32> to vector<8x1xf32>
    %39 = arith.mulf %8, %8 : vector<8x32xf32>
    %cst_15 = arith.constant dense<0.000000e+00> : vector<8xf32>
    %40 = vector.multi_reduction <add>, %39, %cst_15 [1] : vector<8x32xf32> to vector<8xf32>
    %41 = vector.shape_cast %40 : vector<8xf32> to vector<8x1xf32>
    %42 = arith.mulf %17, %17 : vector<8x32xf32>
    %cst_16 = arith.constant dense<0.000000e+00> : vector<8xf32>
    %43 = vector.multi_reduction <add>, %42, %cst_16 [1] : vector<8x32xf32> to vector<8xf32>
    %44 = vector.shape_cast %43 : vector<8xf32> to vector<8x1xf32>
    %cst_17 = arith.constant dense<0.000000e+00> : vector<8x8xf32>
    %45 = tpu.matmul %8, %26, %cst_17 {dimension_numbers = #tpu.dot_dimension_numbers<[1], [1], [0], [0], [0, 0, 1, 0], [], []>} : vector<8x32xf32>, vector<8x32xf32>, vector<8x8xf32> -> vector<8x8xf32>
    %cst_18 = arith.constant dense<0.000000e+00> : vector<8x8xf32>
    %46 = tpu.matmul %8, %35, %cst_18 {dimension_numbers = #tpu.dot_dimension_numbers<[1], [1], [0], [0], [0, 0, 1, 0], [], []>} : vector<8x32xf32>, vector<8x32xf32>, vector<8x8xf32> -> vector<8x8xf32>
    %cst_19 = arith.constant dense<0.000000e+00> : vector<8x8xf32>
    %47 = tpu.matmul %17, %26, %cst_19 {dimension_numbers = #tpu.dot_dimension_numbers<[1], [1], [0], [0], [0, 0, 1, 0], [], []>} : vector<8x32xf32>, vector<8x32xf32>, vector<8x8xf32> -> vector<8x8xf32>
    %cst_20 = arith.constant dense<0.000000e+00> : vector<8x8xf32>
    %48 = tpu.matmul %17, %35, %cst_20 {dimension_numbers = #tpu.dot_dimension_numbers<[1], [1], [0], [0], [0, 0, 1, 0], [], []>} : vector<8x32xf32>, vector<8x32xf32>, vector<8x8xf32> -> vector<8x8xf32>
    %cst_21 = arith.constant 2.000000e+00 : f32
    %49 = vector.broadcast %cst_21 : f32 to vector<8x8xf32>
    %50 = arith.mulf %45, %49 : vector<8x8xf32>
    %51 = math.exp %50 : vector<8x8xf32>
    %cst_22 = arith.constant dense<0.000000e+00> : vector<8xf32>
    %52 = vector.multi_reduction <add>, %51, %cst_22 [1] : vector<8x8xf32> to vector<8xf32>
    %53 = vector.shape_cast %52 : vector<8xf32> to vector<8x1xf32>
    %cst_23 = arith.constant 2.000000e+00 : f32
    %54 = vector.broadcast %cst_23 : f32 to vector<8x8xf32>
    %55 = arith.mulf %46, %54 : vector<8x8xf32>
    %56 = math.exp %55 : vector<8x8xf32>
    %cst_24 = arith.constant dense<0.000000e+00> : vector<8xf32>
    %57 = vector.multi_reduction <add>, %56, %cst_24 [1] : vector<8x8xf32> to vector<8xf32>
    %58 = vector.shape_cast %57 : vector<8xf32> to vector<8x1xf32>
    %59 = arith.addf %53, %58 : vector<8x1xf32>
    %cst_25 = arith.constant 2.000000e+00 : f32
    %60 = vector.broadcast %cst_25 : f32 to vector<8x8xf32>
    %61 = arith.mulf %47, %60 : vector<8x8xf32>
    %62 = math.exp %61 : vector<8x8xf32>
    %cst_26 = arith.constant dense<0.000000e+00> : vector<8xf32>
    %63 = vector.multi_reduction <add>, %62, %cst_26 [1] : vector<8x8xf32> to vector<8xf32>
    %64 = vector.shape_cast %63 : vector<8xf32> to vector<8x1xf32>
    %cst_27 = arith.constant 2.000000e+00 : f32
    %65 = vector.broadcast %cst_27 : f32 to vector<8x8xf32>
    %66 = arith.mulf %48, %65 : vector<8x8xf32>
    %67 = math.exp %66 : vector<8x8xf32>
    %cst_28 = arith.constant dense<0.000000e+00> : vector<8xf32>
    %68 = vector.multi_reduction <add>, %67, %cst_28 [1] : vector<8x8xf32> to vector<8xf32>
    %69 = vector.shape_cast %68 : vector<8xf32> to vector<8x1xf32>
    %70 = arith.addf %64, %69 : vector<8x1xf32>
    %cst_29 = arith.constant 2.000000e+00 : f32
    %71 = vector.broadcast %cst_29 : f32 to vector<8x1xf32>
    %72 = arith.mulf %41, %71 : vector<8x1xf32>
    %73 = math.exp %72 : vector<8x1xf32>
    %74 = arith.subf %59, %73 : vector<8x1xf32>
    %cst_30 = arith.constant 2.000000e+00 : f32
    %75 = vector.broadcast %cst_30 : f32 to vector<8x1xf32>
    %76 = arith.mulf %44, %75 : vector<8x1xf32>
    %77 = math.exp %76 : vector<8x1xf32>
    %78 = arith.subf %70, %77 : vector<8x1xf32>
    %79 = math.log %74 : vector<8x1xf32>
    %cst_31 = arith.constant 2.000000e+00 : f32
    %80 = vector.broadcast %cst_31 : f32 to vector<8x1xf32>
    %81 = arith.mulf %38, %80 : vector<8x1xf32>
    %82 = arith.subf %79, %81 : vector<8x1xf32>
    %c0_32 = arith.constant 0 : index
    %c0_33 = arith.constant 0 : index
    %83 = vector.load %arg5[%c0_32, %c0_33] : memref<16x1xf32, #tpu.memory_space<vmem>>, vector<8x1xf32>
    tpu.vector_store %arg5[%c0_32, %c0_33], %82 {strides = array<i32>} : memref<16x1xf32, #tpu.memory_space<vmem>>, vector<8x1xf32>,
    %84 = math.log %78 : vector<8x1xf32>
    %cst_34 = arith.constant 2.000000e+00 : f32
    %85 = vector.broadcast %cst_34 : f32 to vector<8x1xf32>
    %86 = arith.mulf %38, %85 : vector<8x1xf32>
    %87 = arith.subf %84, %86 : vector<8x1xf32>
    %c8 = arith.constant 8 : index
    %c0_35 = arith.constant 0 : index
    %88 = vector.load %arg5[%c8, %c0_35] : memref<16x1xf32, #tpu.memory_space<vmem>>, vector<8x1xf32>
    tpu.vector_store %arg5[%c8, %c0_35], %87 {strides = array<i32>} : memref<16x1xf32, #tpu.memory_space<vmem>>, vector<8x1xf32>,
    return
  }
  func.func @transform_0(%arg0: i32) -> (i32, i32) {
    %c0_i32 = arith.constant 0 : i32
    %c0_i32_0 = arith.constant 0 : i32
    return %arg0, %c0_i32 : i32, i32
  }
  func.func @transform_1(%arg0: i32) -> (i32, i32) {
    %c0_i32 = arith.constant 0 : i32
    %c0_i32_0 = arith.constant 0 : i32
    return %arg0, %c0_i32 : i32, i32
  }
  func.func @transform_2(%arg0: i32) -> (i32, i32) {
    %c0_i32 = arith.constant 0 : i32
    %c0_i32_0 = arith.constant 0 : i32
    %c0_i32_1 = arith.constant 0 : i32
    return %c0_i32, %c0_i32_0 : i32, i32
  }
  func.func @transform_3(%arg0: i32) -> (i32, i32) {
    %c0_i32 = arith.constant 0 : i32
    %c0_i32_0 = arith.constant 0 : i32
    %c0_i32_1 = arith.constant 0 : i32
    return %c0_i32, %c0_i32_0 : i32, i32
  }
  func.func @transform_4(%arg0: i32) -> (i32, i32) {
    %c0_i32 = arith.constant 0 : i32
    %c0_i32_0 = arith.constant 0 : i32
    return %arg0, %c0_i32 : i32, i32
  }
}

</mosaic_0001>

<bundles_post_ra>
// kernel: tpu_custom_call.1
= control target key start
LH: loop header
LB: loop body
LE: loop exit
PB: predicated region body
PF: predicated region fallthrough
CT: control target
= control target key end

     0   :  { %9 = vsyncpa [#allocation3], 0  ;;  %s673_s0 = inlined_call_operand.hbm [shape: f32[8,32], index: 0, kind: input, shape index: {}]   ;;  %s674_s1 = inlined_call_operand.hbm [shape: f32[8,32], index: 1, kind: input, shape index: {}]   ;;  %s675_s2 = inlined_call_operand.hbm [shape: f32[8,32], index: 2, kind: input, shape index: {}]   ;;  %s676_s3 = inlined_call_operand.hbm [shape: f32[8,32], index: 3, kind: input, shape index: {}]   ;;  %s677_s4 = inlined_call_operand.vmem [shape: f32[16,1], index: 4, kind: output, shape index: {}]  }
   0x1   :  { %10 = vsyncpa [#allocation5], 0 }
   0x2   :  { %11 = vsyncpa [#allocation8], 0  ;;  %s605_s15 = smov [#allocation4]   ;;  %s606_s17 = smov [#allocation2]  }
   0x3   :  { %s28_s16 = sshll.u32 %s605_s15, 4  ;;  %s18_s18 = sshll.u32 %s606_s17, 4  ;;  %s29_s16 = int_to_ptr.vmem [resolvable:$true] %s28_s16  ;;  %s19_s18 = int_to_ptr.vmem [resolvable:$true] %s18_s18 }
   0x4   :  { %s527_s19 = scalar_lea.vmem %s29_s16, 128  ;;  %p532_p1 = scmp.lt.s32.totalorder %s29_s16, %s29_s16 }
   0x5   :  { %p528_p0 = scmp.ne.s32.totalorder %s29_s16, %s527_s19  ;;  %p533_p2 = scmp.lt.s32.totalorder %s527_s19, %s527_s19 }
   0x7   :  { %p534_p3 = por %p533_p2, %p532_p1 }
   0x9   :  { %p535_p4 = pnand %p534_p3, %p528_p0 }
   0xb   :  { %538 = shalt.err (!%p535_p4)
}
   0xc   :  { %31 = dma.hbm_to_vmem [thread:$0]  %s674_s1, 128, %s29_s16, [#allocation5]  }
   0xd   :  { %s547_s22 = scalar_lea.vmem %s19_s18, 128  ;;  %p552_p6 = scmp.lt.s32.totalorder %s19_s18, %s19_s18 }
   0xe   :  { %p548_p5 = scmp.ne.s32.totalorder %s19_s18, %s547_s22  ;;  %p553_p7 = scmp.lt.s32.totalorder %s547_s22, %s547_s22 }
  0x10   :  { %p554_p8 = por %p553_p7, %p552_p6 }
  0x12   :  { %p555_p9 = pnand %p554_p8, %p548_p5 }
  0x14   :  { %558 = shalt.err (!%p555_p9)
}
  0x15   :  { %21 = dma.hbm_to_vmem [thread:$0]  %s673_s0, 128, %s19_s18, [#allocation3]  }
  0x16   :  { %s607_s25 = smov [#allocation6]   ;;  %s608_s27 = smov [#allocation7]  }
  0x17   :  { %s38_s26 = sshll.u32 %s607_s25, 4  ;;  %s48_s28 = sshll.u32 %s608_s27, 4  ;;  %s39_s26 = int_to_ptr.vmem [resolvable:$true] %s38_s26  ;;  %s49_s28 = int_to_ptr.vmem [resolvable:$true] %s48_s28 }
  0x18   :  { %s567_s29 = scalar_lea.vmem %s39_s26, 128  ;;  %p572_p11 = scmp.lt.s32.totalorder %s39_s26, %s39_s26 }
  0x19   :  { %p568_p10 = scmp.ne.s32.totalorder %s39_s26, %s567_s29  ;;  %p573_p12 = scmp.lt.s32.totalorder %s567_s29, %s567_s29 }
  0x1b   :  { %p574_p13 = por %p573_p12, %p572_p11 }
  0x1d   :  { %p575_p0 = pnand %p574_p13, %p568_p10 }
  0x1f   :  { %578 = shalt.err (!%p575_p0)
}
  0x20   :  { %41 = dma.hbm_to_vmem [thread:$0]  %s675_s2, 128, %s39_s26, [#allocation5]  }
  0x21   :  { %s587_s5 = scalar_lea.vmem %s49_s28, 128  ;;  %p592_p2 = scmp.lt.s32.totalorder %s49_s28, %s49_s28 }
  0x22   :  { %p588_p1 = scmp.ne.s32.totalorder %s49_s28, %s587_s5  ;;  %p593_p3 = scmp.lt.s32.totalorder %s587_s5, %s587_s5 }
  0x24   :  { %p594_p4 = por %p593_p3, %p592_p2 }
  0x26   :  { %p595_p5 = pnand %p594_p4, %p588_p1 }
  0x28   :  { %598 = shalt.err (!%p595_p5)
}
  0x29   :  { %51 = dma.hbm_to_vmem [thread:$0]  %s676_s3, 128, %s49_s28, [#allocation8]  }
  0x2a   :  { %599 = dma.done.wait [#allocation3], 128  }
  0x2b   :  { %600 = vsyncadd [#allocation3], 4294967168 }
  0x2c   :  { %601 = dma.done.wait [#allocation5], 256  }
  0x2d   :  { %602 = vsyncadd [#allocation5], 4294967040 }
  0x2e   :  { %603 = dma.done.wait [#allocation8], 128  }
  0x2f   :  { %604 = vsyncadd [#allocation8], 4294967168  ;;  %vm66_vm0 = vcmask 261120   ;;  %v81_v0 = vld [vmem:[#allocation6] sm:$0xff]  ;;  %v64_v1 = vld [vmem:[#allocation2] sm:$0xff]  ;;  %v609_v12 = vmov 0.0  }
  0x30   :  { %v89_v2 = vld [vmem:[#allocation7] sm:$0xff]  ;;  %v82_v3 = vmul.f32 %v81_v0, %v81_v0  ;;  %v65_v4 = vmul.f32 %v64_v1, %v64_v1  ;;  %v73_v6 = vld [vmem:[#allocation4] sm:$0xff]  ;;  %469 = vmatprep.subr.mxu0 %v609_v12  ;;  %474 = vmatprep.subr.mxu1 %v609_v12  ;;  %vm610_vm1 = vmmov 0   ;;  %vm404_vm2 = vcmask 64512  }
  0x31   :  { %v90_v5 = vmul.f32 %v89_v2, %v89_v2  ;;  %v74_v7 = vmul.f32 %v73_v6, %v73_v6  ;;  %471 = vmatprep.mubr.msk.f32.mxu0 %vm610_vm1, %v609_v12  ;;  %476 = vmatprep.mubr.msk.f32.mxu1 %vm610_vm1, %v609_v12  ;;  %vm440_vm3 = vcmask 7168  }
  0x32   :  { %v83_v8 = vsel %vm66_vm0, %v82_v3, 0.0  ;;  %v67_v9 = vsel %vm66_vm0, %v65_v4, 0.0 }
  0x33   :  { %84 = vadd.xlane.f32.xlu0 %v83_v8  ;;  %68 = vadd.xlane.f32.xlu1 %v67_v9  ;;  %v91_v10 = vsel %vm66_vm0, %v90_v5, 0.0  ;;  %v75_v11 = vsel %vm66_vm0, %v74_v7, 0.0 }
  0x37   :  { %92 = vadd.xlane.f32.xlu0 %v91_v10  ;;  %76 = vadd.xlane.f32.xlu1 %v75_v11 }
  0xbc   :  { %v85_v13 = vpop.xlane.xlu0 %84  ;;  %v69_v14 = vpop.xlane.xlu1 %68 }
  0xbd   :  { %v86_v15 = vmax.f32 %v85_v13, 1e-24  ;;  %v70_v16 = vmax.f32 %v69_v14, 1e-24 }
  0xbf   :  { %495 = vrsqrt.f32 %v86_v15 }
  0xc0   :  { %497 = vrsqrt.f32 %v70_v16  ;;  %v93_v17 = vpop.xlane.xlu0 %92  ;;  %v77_v18 = vpop.xlane.xlu1 %76 }
  0xc1   :  { %v94_v19 = vmax.f32 %v93_v17, 1e-24  ;;  %v78_v20 = vmax.f32 %v77_v18, 1e-24 }
  0xc3   :  { %499 = vrsqrt.f32 %v94_v19 }
  0xc4   :  { %501 = vrsqrt.f32 %v78_v20 }
  0xcc   :  { %v496_v21 = vpop.eup %495 }
  0xcd   :  { %v498_v22 = vpop.eup %497  ;;  %v88_v23 = vmul.f32 %v496_v21, %v81_v0 }
  0xce   :  { %v72_v24 = vmul.f32 %v498_v22, %v64_v1 }
  0xcf   :  { %470 = vmatpush3.xpose.msk.msra.mxu0 %vm66_vm0, %v88_v23 }
  0xd0   :  { %v500_v25 = vpop.eup %499  ;;  %479 = vmatprep.subr.mxu0 %v609_v12  ;;  %v101_v26 = vmul.f32 %v72_v24, %v72_v24 }
  0xd1   :  { %v502_v27 = vpop.eup %501  ;;  %v96_v28 = vmul.f32 %v500_v25, %v89_v2 }
  0xd2   :  { %472 = vmatmul.mubr.msk.f32.vlgmr.msra.gmra.mxu0 %vm66_vm0, %v72_v24  ;;  %v80_v29 = vmul.f32 %v502_v27, %v73_v6  ;;  %v102_v30 = vsel %vm66_vm0, %v101_v26, 0.0 }
  0xd3   :  { %475 = vmatpush3.xpose.msk.msra.mxu1 %vm66_vm0, %v96_v28  ;;  %480 = vmatpush3.xpose.msk.msra.mxu0 %vm66_vm0, %v88_v23 }
  0xd4   :  { %481 = vmatprep.mubr.msk.f32.mxu0 %vm610_vm1, %v609_v12  ;;  %484 = vmatprep.subr.mxu1 %v609_v12  ;;  %v105_v31 = vmul.f32 %v80_v29, %v80_v29  ;;  %v97_v32 = vmul.f32 %v80_v29, %v72_v24 }
  0xd5   :  { %103 = vadd.xlane.f32.xlu0 %v102_v30 }
  0xd6   :  { %477 = vmatmul.mubr.msk.f32.vlgmr.msra.gmra.mxu1 %vm66_vm0, %v72_v24  ;;  %482 = vmatmul.mubr.msk.f32.vlgmr.msra.gmra.mxu0 %vm66_vm0, %v80_v29  ;;  %v106_v33 = vsel %vm66_vm0, %v105_v31, 0.0  ;;  %v98_v58 = vsel %vm66_vm0, %v97_v32, 0.0 }
  0xd7   :  { %485 = vmatpush3.xpose.msk.msra.mxu1 %vm66_vm0, %v96_v28  ;;  %486 = vmatprep.mubr.msk.f32.mxu1 %vm610_vm1, %v609_v12 }
  0xd8   :  { %107 = vadd.xlane.f32.xlu1 %v106_v33 }
  0xda   :  { %487 = vmatmul.mubr.msk.f32.vlgmr.msra.gmra.mxu1 %vm66_vm0, %v80_v29 }
 0x15e   :  { %v104_v59 = vpop.xlane.xlu0 %103 }
 0x15f   :  { %v428_v60 = vmul.f32 2.0, %v104_v59 }
 0x161   :  { %v108_v61 = vpop.xlane.xlu1 %107  ;;  %v429_v62 = vmul.f32 1.442695, %v428_v60 }
 0x162   :  { %v432_v63 = vmul.f32 2.0, %v108_v61 }
 0x164   :  { %v433_v0 = vmul.f32 1.442695, %v432_v63 }
 0x192   :  { %v181_v34 = vpop.f32.mrf.mxu0 }
 0x193   :  { %v401_v35 = vmul.f32 2.0, %v181_v34 }
 0x194   :  { %v473_v36 = vpop.f32.mrf.mxu0 }
 0x195   :  { %v402_v37 = vmul.f32 1.442695, %v401_v35 }
 0x196   :  { %v254_v38 = vpop.f32.mrf.mxu1  ;;  %v327_v39 = vpop.f32.mrf.mxu0 }
 0x197   :  { %503 = vpow2.f32 %v402_v37  ;;  %v408_v40 = vmul.f32 2.0, %v254_v38  ;;  %v415_v41 = vmul.f32 2.0, %v327_v39 }
 0x198   :  { %v478_v42 = vpop.f32.mrf.mxu1  ;;  %v483_v43 = vpop.f32.mrf.mxu0 }
 0x199   :  { %v409_v44 = vmul.f32 1.442695, %v408_v40  ;;  %v416_v45 = vmul.f32 1.442695, %v415_v41 }
 0x19a   :  { %v397_v46 = vpop.f32.mrf.mxu1 }
 0x19b   :  { %505 = vpow2.f32 %v409_v44  ;;  %v421_v47 = vmul.f32 2.0, %v397_v46 }
 0x19c   :  { %507 = vpow2.f32 %v416_v45  ;;  %v488_v48 = vpop.f32.mrf.mxu1 }
 0x19d   :  { %v422_v49 = vmul.f32 1.442695, %v421_v47 }
 0x19f   :  { %509 = vpow2.f32 %v422_v49 }
 0x1a0   :  { %511 = vpow2.f32 %v429_v62 }
 0x1a1   :  { %513 = vpow2.f32 %v433_v0 }
 0x1a4   :  { %v504_v50 = vpop.eup %503 }
 0x1a5   :  { %v405_v51 = vsel %vm404_vm2, %v504_v50, 0.0 }
 0x1a6   :  { %406 = vadd.xlane.f32.xlu0 %v405_v51 }
 0x1a8   :  { %v506_v52 = vpop.eup %505 }
 0x1a9   :  { %v508_v53 = vpop.eup %507  ;;  %v411_v54 = vsel %vm404_vm2, %v506_v52, 0.0 }
 0x1aa   :  { %v418_v55 = vsel %vm404_vm2, %v508_v53, 0.0  ;;  %412 = vadd.xlane.f32.xlu1 %v411_v54 }
 0x1ab   :  { %419 = vadd.xlane.f32.xlu0 %v418_v55 }
 0x1ac   :  { %v510_v56 = vpop.eup %509 }
 0x1ad   :  { %v424_v57 = vsel %vm404_vm2, %v510_v56, 0.0  ;;  %v512_v4 = vpop.eup %511 }
 0x1ae   :  { %425 = vadd.xlane.f32.xlu1 %v424_v57  ;;  %v514_v9 = vpop.eup %513 }
 0x1af   :  { %99 = vadd.xlane.f32.xlu0 %v98_v58 }
 0x22f   :  { %v407_v1 = vpop.xlane.xlu0 %406 }
 0x233   :  { %v413_v2 = vpop.xlane.xlu1 %412 }
 0x234   :  { %v414_v3 = vadd.f32 %v413_v2, %v407_v1  ;;  %v420_v6 = vpop.xlane.xlu0 %419 }
 0x236   :  { %v431_v5 = vsub.f32 %v414_v3, %v512_v4 }
 0x237   :  { %v426_v7 = vpop.xlane.xlu1 %425 }
 0x238   :  { %515 = vlog2.f32 %v431_v5  ;;  %v427_v8 = vadd.f32 %v426_v7, %v420_v6  ;;  %v100_v11 = vpop.xlane.xlu0 %99 }
 0x239   :  { %v438_v14 = vmul.f32 2.0, %v100_v11 }
 0x23a   :  { %v435_v10 = vsub.f32 %v427_v8, %v514_v9 }
 0x23c   :  { %517 = vlog2.f32 %v435_v10 }
 0x245   :  { %v516_v12 = vpop.eup %515 }
 0x246   :  { %v437_v13 = vmul.f32 0.6931472, %v516_v12 }
 0x248   :  { %v439_v15 = vsub.f32 %v437_v13, %v438_v14 }
 0x249   :  { %v518_v16 = vpop.eup %517 }
 0x24a   :  { %v443_v17 = vmul.f32 0.6931472, %v518_v16  ;;  %441 = vst.msk [vmem:[%s677_s4] sm:$0xff] %vm440_vm3, %v439_v15 }
 0x24c   :  { %v444_v18 = vsub.f32 %v443_v17, %v438_v14 }
 0x24e   :  { %445 = vst.msk [vmem:[%s677_s4 + $0x8] sm:$0xff] %vm440_vm3, %v444_v18 }
 0x24f   :  { %450 = vsyncpa [#allocation3], 1 }
 0x250   :  { %451 = vsyncpa [#allocation5], 1 }
 0x251   :  { %452 = vsyncpa [#allocation8], 1 }

</bundles_post_ra>
